<compile_context>
chip_gen: v5e
topology: v5e:2x2
jax: 0.10.0
libtpu: 0.0.40
codegen_flags: <defaults>
</compile_context>

<pallas_src>
import functools
import math

import jax
import jax.numpy as jnp
import numpy as np
from jax import lax
from jax.experimental import pallas as pl
from jax.experimental.pallas import tpu as pltpu


def _hint_multiple(x, m):
    """pl.multiple_of for traced values; pass-through for Python ints."""
    if isinstance(x, (int, np.integer)):
        return int(x)
    return pl.multiple_of(x, m)


def attention_kernel(x_ref, wqkv_ref, bqkv_ref, wout_ref, bout_ref, o_ref,
                     qkv_sc, a_sc, *,
                     num_groups, num_heads, eps, tq, lc, L_valid, vb,
                     compute_dtype, exp_dtype):
    """One (batch, q-tile) grid step.

    x_ref    : (1, C, L_pad)  zero-padded input (residual source), resident per batch
    wqkv_ref : (R, C)         augmented qkv weight (scale folded; per-head ones row)
    bqkv_ref : (R, 1)         augmented qkv bias (f32)
    wout_ref : (C, C)         output 1x1-conv weight
    bout_ref : (C, 1)         output bias (f32)
    o_ref    : (1, C, tq)     output tile
    qkv_sc   : (R, L_pad)     per-batch q/k/v(+ones) projection scratch
    a_sc     : (C, tq)        per-tile attention-head accumulator scratch
    """
    qi = pl.program_id(1)
    C = x_ref.shape[1]
    L_pad = x_ref.shape[2]
    gc = C // num_groups
    ch = C // num_heads
    nchunks = L_pad // lc

    # ---- once per batch (first q tile): chunked GroupNorm + qkv projection ----
    @pl.when(qi == 0)
    def _():
        # chunked single-pass stats; padded columns are zero so sums are unaffected,
        # the divisor uses the true (unpadded) length.
        def stats_body(i, carry):
            s_acc, ss_acc = carry
            off = _hint_multiple(i * lc, lc)
            xc = x_ref[0, :, pl.ds(off, lc)].astype(jnp.float32)        # (C, lc)
            return (s_acc + jnp.sum(xc, axis=1, keepdims=True),
                    ss_acc + jnp.sum(xc * xc, axis=1, keepdims=True))

        zeros_c1 = jnp.zeros((C, 1), jnp.float32)
        s_sum, ss_sum = lax.fori_loop(0, nchunks, stats_body,
                                      (zeros_c1, zeros_c1),
                                      unroll=nchunks <= 2)
        g_sum = jnp.sum(s_sum.reshape(num_groups, gc, 1), axis=1, keepdims=True)
        g_ssum = jnp.sum(ss_sum.reshape(num_groups, gc, 1), axis=1, keepdims=True)
        inv_n = 1.0 / float(gc * L_valid)
        mean = g_sum * inv_n
        var = jnp.maximum(g_ssum * inv_n - mean * mean, 0.0)
        rstd = lax.rsqrt(var + eps)
        mean_c = jnp.broadcast_to(mean, (num_groups, gc, 1)).reshape(C, 1)
        rstd_c = jnp.broadcast_to(rstd, (num_groups, gc, 1)).reshape(C, 1)

        # chunked normalize + projection directly into the persistent VMEM scratch
        @pl.loop(0, nchunks)
        def _(i):
            off = _hint_multiple(i * lc, lc)
            xc = x_ref[0, :, pl.ds(off, lc)].astype(jnp.float32)        # (C, lc)
            xn = (xc - mean_c) * rstd_c
            qkvc = jnp.dot(wqkv_ref[...], xn.astype(compute_dtype),
                           preferred_element_type=jnp.float32) + bqkv_ref[...]
            qkv_sc[:, pl.ds(off, lc)] = qkvc.astype(qkv_sc.dtype)

    # ---- per q tile: multi-head attention (scale folded into q/k rows) ----
    qt = _hint_multiple(qi * tq, tq)

    def head_body(h):
        hq = _hint_multiple(h * ch, ch)
        hv = _hint_multiple(2 * C + h * vb, 8)
        q = qkv_sc[pl.ds(hq, ch), pl.ds(qt, tq)]                        # (ch, tq)
        k = qkv_sc[pl.ds(C + hq, ch), :]                                # (ch, L_pad)
        v_aug = qkv_sc[pl.ds(hv, vb), :]                                # (vb, L_pad); row ch == 1

        # key-major scores: s[l, t] = sum_c k[c, l] * q[c, t]
        s = lax.dot_general(k, q, (((0,), (0,)), ((), ())),
                            preferred_element_type=jnp.float32)         # (L_pad, tq) f32
        if L_pad != L_valid:
            key_idx = lax.broadcasted_iota(jnp.int32, (L_pad, tq), 0)
            s = jnp.where(key_idx < L_valid, s, -1e30)                  # mask padded keys
        m = jnp.max(s, axis=0, keepdims=True)                           # (1, tq)
        p = jnp.exp((s - m).astype(exp_dtype)).astype(compute_dtype)    # (L_pad, tq)

        # PV matmul also produces the softmax denominator (ones row of v_aug)
        av = jnp.dot(v_aug, p, preferred_element_type=jnp.float32)      # (vb, tq) f32
        denom = av[ch:ch + 1, :]                                        # (1, tq)
        a = av[:ch, :] * pl.reciprocal(denom, approx=True)              # (ch, tq)
        a_sc[pl.ds(hq, ch), :] = a.astype(a_sc.dtype)

    if num_heads <= 4:
        for h in range(num_heads):            # short static loop: keep LLO visibility
            head_body(h)
    else:
        @pl.loop(0, num_heads)                # bound live (L_pad, tq) temporaries
        def _(h):
            head_body(h)

    # ---- output 1x1 conv + residual add ----
    out = jnp.dot(wout_ref[...], a_sc[...],
                  preferred_element_type=jnp.float32) + bout_ref[...]    # (C, tq)
    x_tile = x_ref[0, :, pl.ds(qt, tq)].astype(jnp.float32)
    o_ref[0] = (out + x_tile).astype(o_ref.dtype)


def _tpu_generation():
    kind = ""
    try:
        kind = jax.devices()[0].device_kind.lower()
    except Exception:
        pass
    for g in ("v7", "v6", "v5", "v4", "v3", "v2"):
        if g in kind:
            return g
    return ""


def _vmem_capacity_bytes(gen):
    try:
        cap = int(pltpu.get_tpu_info().vmem_capacity_bytes)
        if cap > 0:
            return cap
    except Exception:
        pass
    return (64 if gen == "v7" else 128) * 1024 * 1024


def _choose_tq(L_pad, gen):
    if L_pad <= 512:
        return L_pad
    # multiples of 256 keep the v6e/v7x MXU N-dim full; v7x is VMEM-tight -> smaller tq
    prefs = (256, 128, 512) if gen == "v7" else (512, 256, 128)
    for cand in prefs:
        if L_pad % cand == 0:
            return cand
    return L_pad  # unreachable: L_pad is a multiple of 128


def attention_forward(x_nchw, wqkv, bqkv, wout, bout, *, eps=1e-5,
                      compute_dtype=jnp.bfloat16):
    B, C, H, W = x_nchw.shape
    L = H * W
    assert C % 32 == 0, "channel must be divisible by 32 (heads) and 16 (groups)"
    num_groups = C // 16
    num_heads = C // 32
    ch = C // num_heads   # == 32
    gc = C // num_groups  # == 16

    gen = _tpu_generation()
    vmem_cap_bytes = _vmem_capacity_bytes(gen)
    # bf16 exp only where the EUP supports it (v6e / v7x); f32 elsewhere / unknown.
    exp_dtype = compute_dtype if gen in ("v6", "v7") else jnp.float32

    # Zero-pad spatial length to a multiple of 128 -> lane-dense tiles everywhere.
    L_pad = ((L + 127) // 128) * 128
    x = x_nchw.reshape(B, C, L)
    if L_pad != L:
        x = jnp.pad(x, ((0, 0), (0, 0), (0, L_pad - L)))

    tq = _choose_tq(L_pad, gen)
    nqt = L_pad // tq

    # GroupNorm / projection chunk length (bounds the f32 transient).
    lc = L_pad
    if L_pad > 512:
        for cand in (512, 256, 128):
            if L_pad % cand == 0:
                lc = cand
                break

    # One-time parameter fold:
    #  * attention scale 1/sqrt(sqrt(ch)) into the q and k rows of weight and bias,
    #  * per head: ch v rows followed by a zero-weight/bias=1 row (ones row in the
    #    projection, so the PV matmul emits the softmax denominator) and zero rows
    #    padding each head block to a multiple of 8 sublanes.
    scale = 1.0 / math.sqrt(math.sqrt(ch))
    vb = ((ch + 1 + 7) // 8) * 8
    wqkv_f = wqkv.astype(jnp.float32)
    bqkv_f = bqkv.astype(jnp.float32).reshape(3 * C, 1)
    pad_w = jnp.zeros((vb - ch, C), jnp.float32)
    pad_b = jnp.zeros((vb - ch, 1), jnp.float32).at[0, 0].set(1.0)
    w_rows = [wqkv_f[:2 * C] * scale]
    b_rows = [bqkv_f[:2 * C] * scale]
    for h in range(num_heads):
        w_rows += [wqkv_f[2 * C + h * ch: 2 * C + (h + 1) * ch], pad_w]
        b_rows += [bqkv_f[2 * C + h * ch: 2 * C + (h + 1) * ch], pad_b]
    wqkv_aug = jnp.concatenate(w_rows, axis=0).astype(compute_dtype)   # (R, C)
    bqkv_aug = jnp.concatenate(b_rows, axis=0)                         # (R, 1) f32
    R = 2 * C + num_heads * vb
    wout_f = wout.astype(compute_dtype)
    bout_f = bout.astype(jnp.float32).reshape(C, 1)

    kernel = functools.partial(
        attention_kernel, num_groups=num_groups, num_heads=num_heads, eps=eps,
        tq=tq, lc=lc, L_valid=L, vb=vb,
        compute_dtype=compute_dtype, exp_dtype=exp_dtype)

    # Tightened VMEM estimate (includes the chunked GroupNorm transients and one
    # head's (L_pad, tq) score/prob temporaries), capped at 85% of physical VMEM.
    cds = jnp.dtype(compute_dtype).itemsize
    xbytes = x.dtype.itemsize
    est = (2 * C * L_pad * xbytes                 # resident x block (double-buffered)
           + 2 * C * tq * xbytes                  # output block (double-buffered)
           + 2 * (R * C + C * C) * cds            # weights
           + 2 * (R + C) * 4                      # biases
           + R * L_pad * cds                      # persistent qkv(+ones) scratch
           + C * tq * cds                         # per-tile head accumulator
           + L_pad * tq * (8 + cds + 4)           # one head: s (f32), s-m, p, key iota
           + (2 * C + 2 * R) * lc * 4)            # GroupNorm/projection chunk transients
    vmem_limit = int(min(max(int(est * 1.3), 32 * 1024 * 1024),
                         int(0.85 * vmem_cap_bytes)))

    out = pl.pallas_call(
        kernel,
        out_shape=jax.ShapeDtypeStruct((B, C, L_pad), x.dtype),
        grid_spec=pltpu.PrefetchScalarGridSpec(
            num_scalar_prefetch=0,
            grid=(B, nqt),
            in_specs=[
                pl.BlockSpec((1, C, L_pad), lambda b, q: (b, 0, 0)),   # x, resident per batch
                pl.BlockSpec((R, C), lambda b, q: (0, 0)),             # augmented qkv weight
                pl.BlockSpec((R, 1), lambda b, q: (0, 0)),             # augmented qkv bias
                pl.BlockSpec((C, C), lambda b, q: (0, 0)),             # output weight
                pl.BlockSpec((C, 1), lambda b, q: (0, 0)),             # output bias
            ],
            out_specs=pl.BlockSpec((1, C, tq), lambda b, q: (b, 0, q)),
            scratch_shapes=[
                pltpu.VMEM((R, L_pad), compute_dtype),   # per-batch qkv(+ones) projection
                pltpu.VMEM((C, tq), compute_dtype),      # per-tile head accumulator
            ],
        ),
        compiler_params=pltpu.CompilerParams(
            dimension_semantics=("parallel", "arbitrary"),
            vmem_limit_bytes=vmem_limit),
    )(x, wqkv_aug, bqkv_aug, wout_f, bout_f)
    out = out[:, :, :L]
    return out.reshape(B, C, H, W)


def ref_forward(x_nchw, wqkv, bqkv, wout, bout, *, eps=1e-5):
    """Plain-JAX (f32) reference mirroring the PyTorch forward exactly."""
    B, C, H, W = x_nchw.shape
    L = H * W
    num_heads = C // 32
    num_groups = C // 16
    x = x_nchw.reshape(B, C, L)
    skip = x
    xg = x.reshape(B, num_groups, -1)
    mean = xg.mean(-1, keepdims=True)
    var = ((xg - mean) ** 2).mean(-1, keepdims=True)
    xn = ((xg - mean) / jnp.sqrt(var + eps)).reshape(B, C, L)
    qkv = jnp.einsum('oc,bcl->bol', wqkv, xn) + bqkv[None, :, :]
    ch = C // num_heads
    q, k, v = jnp.split(qkv, 3, axis=1)
    scale = 1.0 / math.sqrt(math.sqrt(ch))
    qh = (q * scale).reshape(B * num_heads, ch, L)
    kh = (k * scale).reshape(B * num_heads, ch, L)
    vh = v.reshape(B * num_heads, ch, L)
    w = jnp.einsum('bct,bcs->bts', qh, kh)
    w = jax.nn.softmax(w, axis=-1)
    a = jnp.einsum('bts,bcs->bct', w, vh).reshape(B, C, L)
    out = jnp.einsum('oc,bcl->bol', wout, a) + bout[None, :, :]
    out = out + skip
    return out.reshape(B, C, H, W)


if __name__ == "__main__":
    # channel must be divisible by 32 (heads) and 16 (groups) -> smallest is 32.
    B, C, H, W = 2, 32, 8, 8
    key = jax.random.PRNGKey(0)
    k_x, k_wq, k_bq, k_wo, k_bo = jax.random.split(key, 5)

    x = jax.random.normal(k_x, (B, C, H, W), dtype=jnp.float32)

    # qkv = nn.Conv1d(C, 3C, 1): weight (3C, C) (kernel size 1 squeezed), bias (3C, 1)
    wqkv = 0.05 * jax.random.normal(k_wq, (3 * C, C), dtype=jnp.float32)
    bqkv = 0.01 * jax.random.normal(k_bq, (3 * C, 1), dtype=jnp.float32)

    # Case 1: module as constructed -> zero_out(nn.Conv1d(C, C, 1)): all params zero.
    wout0 = jnp.zeros((C, C), dtype=jnp.float32)
    bout0 = jnp.zeros((C, 1), dtype=jnp.float32)
    y0 = jax.block_until_ready(attention_forward(x, wqkv, bqkv, wout0, bout0))
    y0_ref = ref_forward(x, wqkv, bqkv, wout0, bout0)
    np.testing.assert_allclose(np.asarray(y0), np.asarray(y0_ref), rtol=1e-5, atol=1e-5)

    # Case 2: non-zero output conv to exercise the full attention path
    # (bf16 matmul operands + approx reciprocal -> slightly looser tolerance).
    wout = 0.05 * jax.random.normal(k_wo, (C, C), dtype=jnp.float32)
    bout = 0.01 * jax.random.normal(k_bo, (C, 1), dtype=jnp.float32)
    y = jax.block_until_ready(attention_forward(x, wqkv, bqkv, wout, bout))
    y_ref = ref_forward(x, wqkv, bqkv, wout, bout)
    np.testing.assert_allclose(np.asarray(y), np.asarray(y_ref), rtol=1e-2, atol=1e-2)

    print("KERNEL_OK")
</pallas_src>

<mosaic_0001>
module attributes {stable_mosaic.version = 11 : i64} {
  func.func @attention_kernel(%arg0: i32, %arg1: i32, %arg2: memref<1x32x128xf32, #tpu.memory_space<vmem>>, %arg3: memref<104x32xbf16, #tpu.memory_space<vmem>>, %arg4: memref<104x1xf32, #tpu.memory_space<vmem>>, %arg5: memref<32x32xbf16, #tpu.memory_space<vmem>>, %arg6: memref<32x1xf32, #tpu.memory_space<vmem>>, %arg7: memref<1x32x128xf32, #tpu.memory_space<vmem>>, %arg8: memref<104x128xbf16, #tpu.memory_space<vmem>>, %arg9: memref<32x128xbf16, #tpu.memory_space<vmem>>) attributes {dimension_semantics = [#tpu.dimension_semantics<parallel>, #tpu.dimension_semantics<arbitrary>], iteration_bounds = array<i64: 2, 1>, scalar_prefetch = 0 : i64, scratch_operands = 2 : i64, tpu.core_type = #tpu.core_type<tc>, window_params = [{transform_indices = @transform_0, window_bounds = array<i64: 1, 32, 128>}, {pipeline_mode = #tpu.pipeline_mode<synchronous>, transform_indices = @transform_1, window_bounds = array<i64: 104, 32>}, {pipeline_mode = #tpu.pipeline_mode<synchronous>, transform_indices = @transform_2, window_bounds = array<i64: 104, 1>}, {pipeline_mode = #tpu.pipeline_mode<synchronous>, transform_indices = @transform_3, window_bounds = array<i64: 32, 32>}, {pipeline_mode = #tpu.pipeline_mode<synchronous>, transform_indices = @transform_4, window_bounds = array<i64: 32, 1>}, {transform_indices = @transform_5, window_bounds = array<i64: 1, 32, 128>}]} {
    %c0_i32 = arith.constant 0 : i32
    %0 = arith.cmpi eq, %arg1, %c0_i32 : i32
    %1 = arith.extui %0 : i1 to i32
    %c0_i32_0 = arith.constant 0 : i32
    %2 = arith.cmpi ne, %1, %c0_i32_0 : i32
    scf.if %2 {
      %cst_20 = arith.constant 0.000000e+00 : f32
      %42 = vector.broadcast %cst_20 : f32 to vector<32x1xf32>
      %c0_i32_21 = arith.constant 0 : i32
      %c128_i32_22 = arith.constant 128 : i32
      %43 = arith.muli %c0_i32_21, %c128_i32_22 : i32
      %44 = tpu.assume_multiple %43, 128 : i32
      %c0_23 = arith.constant 0 : index
      %c0_24 = arith.constant 0 : index
      %45 = arith.index_cast %44 : i32 to index
      %46 = vector.load %arg2[%c0_23, %c0_24, %45] : memref<1x32x128xf32, #tpu.memory_space<vmem>>, vector<1x32x128xf32>
      %47 = vector.shape_cast %46 : vector<1x32x128xf32> to vector<32x128xf32>
      %cst_25 = arith.constant dense<0.000000e+00> : vector<32xf32>
      %48 = vector.multi_reduction <add>, %47, %cst_25 [1] : vector<32x128xf32> to vector<32xf32>
      %49 = vector.shape_cast %48 : vector<32xf32> to vector<32x1xf32>
      %50 = arith.addf %42, %49 : vector<32x1xf32>
      %51 = arith.mulf %47, %47 : vector<32x128xf32>
      %cst_26 = arith.constant dense<0.000000e+00> : vector<32xf32>
      %52 = vector.multi_reduction <add>, %51, %cst_26 [1] : vector<32x128xf32> to vector<32xf32>
      %53 = vector.shape_cast %52 : vector<32xf32> to vector<32x1xf32>
      %54 = arith.addf %42, %53 : vector<32x1xf32>
      %c1_i32 = arith.constant 1 : i32
      %55 = vector.shape_cast %50 : vector<32x1xf32> to vector<2x16x1xf32>
      %cst_27 = arith.constant dense<0.000000e+00> : vector<2x1xf32>
      %56 = vector.multi_reduction <add>, %55, %cst_27 [1] : vector<2x16x1xf32> to vector<2x1xf32>
      %57 = vector.shape_cast %56 : vector<2x1xf32> to vector<2x1x1xf32>
      %58 = vector.shape_cast %54 : vector<32x1xf32> to vector<2x16x1xf32>
      %cst_28 = arith.constant dense<0.000000e+00> : vector<2x1xf32>
      %59 = vector.multi_reduction <add>, %58, %cst_28 [1] : vector<2x16x1xf32> to vector<2x1xf32>
      %60 = vector.shape_cast %59 : vector<2x1xf32> to vector<2x1x1xf32>
      %cst_29 = arith.constant 9.765625E-4 : f32
      %61 = vector.broadcast %cst_29 : f32 to vector<2x1x1xf32>
      %62 = arith.mulf %57, %61 : vector<2x1x1xf32>
      %cst_30 = arith.constant 9.765625E-4 : f32
      %63 = vector.broadcast %cst_30 : f32 to vector<2x1x1xf32>
      %64 = arith.mulf %60, %63 : vector<2x1x1xf32>
      %65 = arith.mulf %62, %62 : vector<2x1x1xf32>
      %66 = arith.subf %64, %65 : vector<2x1x1xf32>
      %cst_31 = arith.constant 0.000000e+00 : f32
      %67 = vector.broadcast %cst_31 : f32 to vector<2x1x1xf32>
      %68 = arith.maximumf %66, %67 : vector<2x1x1xf32>
      %cst_32 = arith.constant 9.99999974E-6 : f32
      %69 = vector.broadcast %cst_32 : f32 to vector<2x1x1xf32>
      %70 = arith.addf %68, %69 : vector<2x1x1xf32>
      %71 = math.rsqrt %70 : vector<2x1x1xf32>
      %72 = vector.shape_cast %62 : vector<2x1x1xf32> to vector<2x1x1xf32>
      %73 = vector.broadcast %72 : vector<2x1x1xf32> to vector<2x16x1xf32>
      %74 = vector.shape_cast %73 : vector<2x16x1xf32> to vector<32x1xf32>
      %75 = vector.shape_cast %71 : vector<2x1x1xf32> to vector<2x1x1xf32>
      %76 = vector.broadcast %75 : vector<2x1x1xf32> to vector<2x16x1xf32>
      %77 = vector.shape_cast %76 : vector<2x16x1xf32> to vector<32x1xf32>
      %c0_i32_33 = arith.constant 0 : i32
      %c1_i32_34 = arith.constant 1 : i32
      %78 = arith.muli %c0_i32_33, %c1_i32_34 : i32
      %c0_i32_35 = arith.constant 0 : i32
      %79 = arith.addi %c0_i32_35, %78 : i32
      %c128_i32_36 = arith.constant 128 : i32
      %80 = arith.muli %79, %c128_i32_36 : i32
      %81 = tpu.assume_multiple %80, 128 : i32
      %c0_37 = arith.constant 0 : index
      %c0_38 = arith.constant 0 : index
      %82 = arith.index_cast %81 : i32 to index
      %83 = vector.load %arg2[%c0_37, %c0_38, %82] : memref<1x32x128xf32, #tpu.memory_space<vmem>>, vector<1x32x128xf32>
      %84 = vector.shape_cast %83 : vector<1x32x128xf32> to vector<32x128xf32>
      %85 = vector.broadcast %74 : vector<32x1xf32> to vector<32x128xf32>
      %86 = arith.subf %84, %85 : vector<32x128xf32>
      %87 = vector.broadcast %77 : vector<32x1xf32> to vector<32x128xf32>
      %88 = arith.mulf %86, %87 : vector<32x128xf32>
      %c0_39 = arith.constant 0 : index
      %c0_40 = arith.constant 0 : index
      %89 = vector.load %arg3[%c0_39, %c0_40] : memref<104x32xbf16, #tpu.memory_space<vmem>>, vector<104x32xbf16>
      %90 = arith.truncf %88 : vector<32x128xf32> to vector<32x128xbf16>
      %cst_41 = arith.constant dense<0.000000e+00> : vector<104x128xf32>
      %91 = tpu.matmul %89, %90, %cst_41 {dimension_numbers = #tpu.dot_dimension_numbers<[1], [0], [0], [1], [0, 0, 1, 1], [], []>} : vector<104x32xbf16>, vector<32x128xbf16>, vector<104x128xf32> -> vector<104x128xf32>
      %c0_42 = arith.constant 0 : index
      %c0_43 = arith.constant 0 : index
      %92 = vector.load %arg4[%c0_42, %c0_43] : memref<104x1xf32, #tpu.memory_space<vmem>>, vector<104x1xf32>
      %93 = vector.broadcast %92 : vector<104x1xf32> to vector<104x128xf32>
      %94 = arith.addf %91, %93 : vector<104x128xf32>
      %95 = arith.truncf %94 : vector<104x128xf32> to vector<104x128xbf16>
      %c0_44 = arith.constant 0 : index
      %96 = arith.index_cast %81 : i32 to index
      %97 = vector.load %arg8[%c0_44, %96] : memref<104x128xbf16, #tpu.memory_space<vmem>>, vector<104x128xbf16>
      tpu.vector_store %arg8[%c0_44, %96], %95 {strides = array<i32>} : memref<104x128xbf16, #tpu.memory_space<vmem>>, vector<104x128xbf16>,
      %c1_i32_45 = arith.constant 1 : i32
    } else {
    }
    %c128_i32 = arith.constant 128 : i32
    %3 = arith.muli %arg1, %c128_i32 : i32
    %4 = tpu.assume_multiple %3, 128 : i32
    %c0 = arith.constant 0 : index
    %5 = arith.index_cast %4 : i32 to index
    %6 = vector.load %arg8[%c0, %5] : memref<104x128xbf16, #tpu.memory_space<vmem>>, vector<32x128xbf16>
    %c32 = arith.constant 32 : index
    %c0_1 = arith.constant 0 : index
    %7 = vector.load %arg8[%c32, %c0_1] : memref<104x128xbf16, #tpu.memory_space<vmem>>, vector<32x128xbf16>
    %c64 = arith.constant 64 : index
    %c0_2 = arith.constant 0 : index
    %8 = vector.load %arg8[%c64, %c0_2] : memref<104x128xbf16, #tpu.memory_space<vmem>>, vector<40x128xbf16>
    %cst = arith.constant dense<0.000000e+00> : vector<128x128xf32>
    %9 = tpu.matmul %7, %6, %cst {dimension_numbers = #tpu.dot_dimension_numbers<[0], [0], [1], [1], [0, 1, 1, 1], [], []>} : vector<32x128xbf16>, vector<32x128xbf16>, vector<128x128xf32> -> vector<128x128xf32>
    %10 = tpu.iota {dimensions = array<i32: 0>} : vector<128x128xi32>
    %c64_i32 = arith.constant 64 : i32
    %11 = vector.broadcast %c64_i32 : i32 to vector<128x128xi32>
    %12 = arith.cmpi slt, %10, %11 : vector<128x128xi32>
    %cst_3 = arith.constant -1.000000e+30 : f32
    %13 = vector.broadcast %cst_3 : f32 to vector<128x128xf32>
    %14 = arith.select %12, %9, %13 : vector<128x128xi1>, vector<128x128xf32>
    %cst_4 = arith.constant dense<0xFF800000> : vector<128xf32>
    %15 = vector.multi_reduction <maximumf>, %14, %cst_4 [0] : vector<128x128xf32> to vector<128xf32>
    %16 = vector.shape_cast %15 : vector<128xf32> to vector<1x128xf32>
    %17 = vector.broadcast %16 : vector<1x128xf32> to vector<128x128xf32>
    %18 = arith.subf %14, %17 : vector<128x128xf32>
    %19 = math.exp %18 : vector<128x128xf32>
    %20 = arith.truncf %19 : vector<128x128xf32> to vector<128x128xbf16>
    %cst_5 = arith.constant dense<0.000000e+00> : vector<40x128xf32>
    %21 = tpu.matmul %8, %20, %cst_5 {dimension_numbers = #tpu.dot_dimension_numbers<[1], [0], [0], [1], [0, 0, 1, 1], [], []>} : vector<40x128xbf16>, vector<128x128xbf16>, vector<40x128xf32> -> vector<40x128xf32>
    %22 = vector.extract_strided_slice %21 {offsets = [32, 0], sizes = [1, 128], strides = [1, 1]} : vector<40x128xf32> to vector<1x128xf32>
    %23 = vector.extract_strided_slice %21 {offsets = [0, 0], sizes = [32, 128], strides = [1, 1]} : vector<40x128xf32> to vector<32x128xf32>
    %24 = tpu.reciprocal %22 {approx = true} : vector<1x128xf32> -> vector<1x128xf32>
    %25 = vector.broadcast %24 : vector<1x128xf32> to vector<32x128xf32>
    %26 = arith.mulf %23, %25 : vector<32x128xf32>
    %27 = arith.truncf %26 : vector<32x128xf32> to vector<32x128xbf16>
    %c0_6 = arith.constant 0 : index
    %c0_7 = arith.constant 0 : index
    %28 = vector.load %arg9[%c0_6, %c0_7] : memref<32x128xbf16, #tpu.memory_space<vmem>>, vector<32x128xbf16>
    tpu.vector_store %arg9[%c0_6, %c0_7], %27 {strides = array<i32>} : memref<32x128xbf16, #tpu.memory_space<vmem>>, vector<32x128xbf16>,
    %c0_8 = arith.constant 0 : index
    %c0_9 = arith.constant 0 : index
    %29 = vector.load %arg5[%c0_8, %c0_9] : memref<32x32xbf16, #tpu.memory_space<vmem>>, vector<32x32xbf16>
    %c0_10 = arith.constant 0 : index
    %c0_11 = arith.constant 0 : index
    %30 = vector.load %arg9[%c0_10, %c0_11] : memref<32x128xbf16, #tpu.memory_space<vmem>>, vector<32x128xbf16>
    %cst_12 = arith.constant dense<0.000000e+00> : vector<32x128xf32>
    %31 = tpu.matmul %29, %30, %cst_12 {dimension_numbers = #tpu.dot_dimension_numbers<[1], [0], [0], [1], [0, 0, 1, 1], [], []>} : vector<32x32xbf16>, vector<32x128xbf16>, vector<32x128xf32> -> vector<32x128xf32>
    %c0_13 = arith.constant 0 : index
    %c0_14 = arith.constant 0 : index
    %32 = vector.load %arg6[%c0_13, %c0_14] : memref<32x1xf32, #tpu.memory_space<vmem>>, vector<32x1xf32>
    %33 = vector.broadcast %32 : vector<32x1xf32> to vector<32x128xf32>
    %34 = arith.addf %31, %33 : vector<32x128xf32>
    %c0_15 = arith.constant 0 : index
    %c0_16 = arith.constant 0 : index
    %35 = arith.index_cast %4 : i32 to index
    %36 = vector.load %arg2[%c0_15, %c0_16, %35] : memref<1x32x128xf32, #tpu.memory_space<vmem>>, vector<1x32x128xf32>
    %37 = vector.shape_cast %36 : vector<1x32x128xf32> to vector<32x128xf32>
    %38 = arith.addf %34, %37 : vector<32x128xf32>
    %c0_17 = arith.constant 0 : index
    %c0_18 = arith.constant 0 : index
    %c0_19 = arith.constant 0 : index
    %39 = vector.load %arg7[%c0_17, %c0_18, %c0_19] : memref<1x32x128xf32, #tpu.memory_space<vmem>>, vector<1x32x128xf32>
    %40 = vector.shape_cast %39 : vector<1x32x128xf32> to vector<32x128xf32>
    %41 = vector.shape_cast %38 : vector<32x128xf32> to vector<1x32x128xf32>
    tpu.vector_store %arg7[%c0_17, %c0_18, %c0_19], %41 {strides = array<i32>} : memref<1x32x128xf32, #tpu.memory_space<vmem>>, vector<1x32x128xf32>,
    return
  }
  func.func @transform_0(%arg0: i32, %arg1: i32) -> (i32, i32, i32) {
    %c0_i32 = arith.constant 0 : i32
    %c0_i32_0 = arith.constant 0 : i32
    %c0_i32_1 = arith.constant 0 : i32
    return %arg0, %c0_i32, %c0_i32_0 : i32, i32, i32
  }
  func.func @transform_1(%arg0: i32, %arg1: i32) -> (i32, i32) {
    %c0_i32 = arith.constant 0 : i32
    %c0_i32_0 = arith.constant 0 : i32
    %c0_i32_1 = arith.constant 0 : i32
    return %c0_i32, %c0_i32_0 : i32, i32
  }
  func.func @transform_2(%arg0: i32, %arg1: i32) -> (i32, i32) {
    %c0_i32 = arith.constant 0 : i32
    %c0_i32_0 = arith.constant 0 : i32
    %c0_i32_1 = arith.constant 0 : i32
    return %c0_i32, %c0_i32_0 : i32, i32
  }
  func.func @transform_3(%arg0: i32, %arg1: i32) -> (i32, i32) {
    %c0_i32 = arith.constant 0 : i32
    %c0_i32_0 = arith.constant 0 : i32
    %c0_i32_1 = arith.constant 0 : i32
    return %c0_i32, %c0_i32_0 : i32, i32
  }
  func.func @transform_4(%arg0: i32, %arg1: i32) -> (i32, i32) {
    %c0_i32 = arith.constant 0 : i32
    %c0_i32_0 = arith.constant 0 : i32
    %c0_i32_1 = arith.constant 0 : i32
    return %c0_i32, %c0_i32_0 : i32, i32
  }
  func.func @transform_5(%arg0: i32, %arg1: i32) -> (i32, i32, i32) {
    %c0_i32 = arith.constant 0 : i32
    %c0_i32_0 = arith.constant 0 : i32
    return %arg0, %c0_i32, %arg1 : i32, i32, i32
  }
}

</mosaic_0001>

<bundles_post_ra>
// kernel: tpu_custom_call.1
= control target key start
LH: loop header
LB: loop body
LE: loop exit
PB: predicated region body
PF: predicated region fallthrough
CT: control target
= control target key end

     0   :  { %10 = vsyncpa [#allocation5], 0  ;;  %s1642_s0 = inlined_call_operand.vmem [shape: f32[2,32,128], index: 0, kind: input, shape index: {}]   ;;  %s1643_s1 = inlined_call_operand.vmem [shape: bf16[104,32], index: 1, kind: input, shape index: {}]   ;;  %s1644_s2 = inlined_call_operand.vmem [shape: f32[104,1], index: 2, kind: input, shape index: {}]   ;;  %s1645_s3 = inlined_call_operand.vmem [shape: bf16[32,32], index: 3, kind: input, shape index: {}]   ;;  %s1646_s4 = inlined_call_operand.vmem [shape: f32[32,1], index: 4, kind: input, shape index: {}]   ;;  %s1647_s5 = inlined_call_operand.hbm [shape: f32[2,32,128], index: 5, kind: output, shape index: {}]  }
   0x1   :  { %12 = vsyncpa [#allocation5 + $0x1], 0  ;;  %s1414_s18 = smov 0   ;;  %s1416_s19 = smov 0  }
   0x2   :  { %s1418_s20 = smov 0   ;;  %s1420_s21 = smov 0  }
   0x3   :  { %s1422_s22 = smov 0   ;;  %s1424_s23 = smov 0  }
   0x4 LB: > { %s1054_s24 = sadd.s32 4294967295, %s1379_s23   ;;  %s1055_s25 = sadd.s32 4294967294, %s1379_s23   ;;  %s1379_s23 = sphi %s1424_s23, %s18_s23   ;;  %s1375_s22 = sphi %s1422_s22, %s1654_s22   ;;  %s1371_s21 = sphi %s1420_s21, %s1653_s21   ;;  %s1367_s20 = sphi %s1418_s20, %s1652_s20   ;;  %s1363_s19 = sphi %s1416_s19, %s1651_s19   ;;  %s1359_s18 = sphi %s1414_s18, %s1650_s18  }
   0x5   : > { %s30_s26 = sadd.s32 1, %s1375_s22  ;;  %s149_s27 = sadd.s32 1, %s1367_s20 }
   0x6   : > { %p32_p0 = scmp.ge.s32.totalorder %s30_s26, 2  ;;  %p159_p1 = scmp.ne.s32.totalorder %s1367_s20, %s1363_s19 }
   0x7   : > { %p160_p2 = scmp.eq.s32.totalorder %s1054_s24, 1  ;;  %p165_p3 = scmp.ne.s32.totalorder %s1363_s19, %s1359_s18 }
   0x8   : > { %s1656_s26 = smov (%p32_p0, %s30_s26), 0  ;;  %p166_p5 = scmp.eq.s32.totalorder %s1055_s25, 1 }
   0x9   : > { %p1454_p4 = por %p160_p2, %p159_p1  ;;  %s144_s29 = ssub.s32 %s1375_s22, %s1656_s26 }
   0xa   : > { %p1058_p6 = scmp.ge.s32.totalorder %s1379_s23, 1  ;;  %p147_p7 = scmp.eq.s32.totalorder %s144_s29, 0 }
   0xb   : > { %p1461_p8 = por %p166_p5, %p165_p3  ;;  %p204_p9 = scmp.lt.s32.totalorder %s1379_s23, 3 }
   0xc   : > { %s1467_s6 = scalar_select %p147_p7, %s1367_s20, %s149_s27  }
   0xd   : > { %p205_p10 = pnand %p1058_p6, %p204_p9 }
   0xe   : > { %p232_p11 = scmp.lt.s32.totalorder (!%p205_p10), %s1371_s21, 1  ;;  %s229_s25 = sand.u32 (!%p205_p10), 1, %s1363_s19  }
   0xf   : > { %208 = sbr.rel (%p205_p10) target bundleno = 1162 (0x48a), region = 40  ;;  %s1059_s27 = sshll.u32 (!%p205_p10), %s229_s25, 5 }
  0x10   : > { %s231_s29 = scalar_lea.vmem (!%p205_p10), [#allocation4], %s1059_s27  ;;  %s963_s13 = scalar_lea.sflag (!%p205_p10), [#allocation5], %s229_s25 }
  0x11   : > { %s1321_s17 = scalar_lea.hbm (!%p205_p10), %s1647_s5, 64 }
  0x14   : > { %s233_s7 = scalar_select %p232_p11, %s1371_s21, 1  ;;  %v363_v53 = vld [vmem:[%s1644_s2 + $0x30] sm:$0xff]  ;;  %v361_v54 = vld [vmem:[%s1644_s2 + $0x20] sm:$0xff]  ;;  %v1381_v56 = vmov 0   ;;  %v360_v61 = vld [vmem:[%s1644_s2 + $0x18] sm:$0xff]  ;;  %vm468_vm6 = vcmask 261120  }
  0x15   : > { %1276 = vset.pattern.permute.xlu1 %v1381_v56  ;;  %1274 = vset.pattern.permute.xlu2 %v1381_v56 }
  0x16   : > { %s1148_s8 = sshll.u32 %s233_s7, 5  ;;  %1275 = vset.pattern.permute.xlu0 %v1381_v56  ;;  %s1165_s7 = sshll.u32 %s1371_s21, 5 }
  0x17   : > { %s236_s11 = scalar_lea.vmem %s1642_s0, %s1148_s8  ;;  %s975_s10 = scalar_lea.hbm %s1647_s5, %s1165_s7 }
  0x18   : > { %v1474_v0 = vld [vmem:[%s236_s11 + $0x10] sm:$0xff]  ;;  %v1476_v1 = vld [vmem:[%s236_s11] sm:$0xff]  ;;  %v1482_v3 = vld [vmem:[%s236_s11 + $0x18] sm:$0xff]  ;;  %s978_s12 = sshll.u32 %s975_s10, 4  ;;  %s979_s12 = int_to_ptr.hbm [resolvable:$true] %s978_s12 }
  0x19   : > { %250 = vadd.xlane.f32.xlu0 %v1474_v0  ;;  %246 = vadd.xlane.f32.xlu2 %v1476_v1  ;;  %v260_v2 = vmul.f32 %v1474_v0, %v1474_v0  ;;  %v1484_v4 = vld [vmem:[%s236_s11 + $0x8] sm:$0xff]  ;;  %v261_v5 = vmul.f32 %v1482_v3, %v1482_v3  ;;  %v258_v6 = vmul.f32 %v1476_v1, %v1476_v1  ;;  %s976_s11 = sshll.u32 %s231_s29, 4  ;;  %s1315_s21 = sshra.s32 %s979_s12, 4  ;;  %s977_s11 = int_to_ptr.vmem [resolvable:$true] %s976_s11  ;;  %s1316_s21 = int_to_ptr.hbm [resolvable:$true] %s1315_s21 }
  0x1a   : > { %v259_v7 = vmul.f32 %v1484_v4, %v1484_v4  ;;  %s1317_s14 = scalar_lea.hbm %s1316_s21, 32  ;;  %p1322_p1 = scmp.lt.s32.totalorder %s1316_s21, %s1647_s5 }
  0x1b   : > { %266 = vadd.xlane.f32.xlu1 %v260_v2  ;;  %p1318_p12 = scmp.ne.s32.totalorder %s1316_s21, %s1317_s14  ;;  %p1323_p2 = scmp.lt.s32.totalorder %s1321_s17, %s1317_s14 }
  0x1d   : > { %p1319_p13 = pnand %p1318_p12, %p1454_p4  ;;  %p1324_p3 = por %p1323_p2, %p1322_p1 }
  0x1f   : > { %p1320_p0 = pneg %p1319_p13 }
  0x21   : > { %252 = vadd.xlane.f32.xlu0 %v1482_v3  ;;  %248 = vadd.xlane.f32.xlu2 %v1484_v4  ;;  %p1325_p5 = pnand %p1324_p3, %p1320_p0 }
  0x23   : > { %268 = vadd.xlane.f32.xlu1 %v261_v5 }
  0x29   : > { %262 = vadd.xlane.f32.xlu0 %v258_v6 }
  0x2b   : > { %264 = vadd.xlane.f32.xlu1 %v259_v7 }
  0x39   : > { %392 = vperm.xlu2 %1274, %v361_v54  }
  0x44   : > { %402 = vperm.xlu1 %1276, %v363_v53  }
  0x4c   : > { %387 = vperm.xlu1 %1276, %v360_v61  }
  0x8c   : > { %v251_v8 = vpop.xlane.xlu0 %250  ;;  %v247_v9 = vpop.xlane.xlu2 %246 }
  0x8e   : > { %v267_v10 = vpop.xlane.xlu1 %266 }
  0x94   : > { %v253_v11 = vpop.xlane.xlu0 %252  ;;  %v249_v12 = vpop.xlane.xlu2 %248 }
  0x95   : > { %v281_v13 = vadd.f32 %v253_v11, %v251_v8  ;;  %v274_v14 = vadd.f32 %v249_v12, %v247_v9  ;;  %v358_v12 = vld [vmem:[%s1644_s2 + $0x8] sm:$0xff] }
  0x96   : > { %v269_v15 = vpop.xlane.xlu1 %268  ;;  %377 = vperm.xlu1 %1276, %v358_v12  }
  0x97   : > { %v282_v16 = vrot.slane %v281_v13, 4  ;;  %v275_v17 = vrot.slane %v274_v14, 4  ;;  %v295_v18 = vadd.f32 %v269_v15, %v267_v10 }
  0x99   : > { %v283_v19 = vadd.f32 %v282_v16, %v281_v13  ;;  %v276_v20 = vadd.f32 %v275_v17, %v274_v14  ;;  %v296_v21 = vrot.slane %v295_v18, 4  ;;  %v364_v13 = vld [vmem:[%s1644_s2 + $0x38] sm:$0xff] }
  0x9a   : > { %407 = vperm.xlu2 %1274, %v364_v13  }
  0x9b   : > { %v284_v22 = vrot.slane %v283_v19, 2  ;;  %v277_v23 = vrot.slane %v276_v20, 2  ;;  %v297_v24 = vadd.f32 %v296_v21, %v295_v18 }
  0x9c   : > { %v263_v25 = vpop.xlane.xlu0 %262 }
  0x9d   : > { %v285_v26 = vadd.f32 %v284_v22, %v283_v19  ;;  %v278_v27 = vadd.f32 %v277_v23, %v276_v20  ;;  %v298_v28 = vrot.slane %v297_v24, 2  ;;  %v359_v20 = vld [vmem:[%s1644_s2 + $0x10] sm:$0xff] }
  0x9e   : > { %v265_v29 = vpop.xlane.xlu1 %264 }
  0x9f   : > { %v286_v30 = vrot.slane %v285_v26, 1  ;;  %v299_v31 = vadd.f32 %v298_v28, %v297_v24  ;;  %v288_v32 = vadd.f32 %v265_v29, %v263_v25  ;;  %v279_v34 = vrot.slane %v278_v27, 1  ;;  %v354_v28 = vld [vmem:[%s1643_s1 + $0x30] sm:$0xf] }
  0xa0   : > { %v460_v29 = vunpack.c.l.b16 %v354_v28 }
  0xa1   : > { %v287_v33 = vadd.f32 %v286_v30, %v285_v26  ;;  %v300_v35 = vrot.slane %v299_v31, 1  ;;  %v289_v36 = vrot.slane %v288_v32, 4  ;;  %v280_v40 = vadd.f32 %v279_v34, %v278_v27  ;;  %v1149_v27 = vld [vmem:[%s1643_s1] sm:$0xff]  ;;  %v1150_v34 = vld [vmem:[%s1643_s1 + $0x8] sm:$0xff] }
  0xa2   : > { %382 = vperm.xlu2 %1274, %v359_v20   ;;  %v357_v30 = vld [vmem:[%s1644_s2] sm:$0xff] }
  0xa3   : > { %v303_v37 = vmul.f32 0.0009765625, %v287_v33  ;;  %v301_v38 = vadd.f32 %v300_v35, %v299_v31  ;;  %v290_v39 = vadd.f32 %v289_v36, %v288_v32  ;;  %v302_v46 = vmul.f32 0.0009765625, %v280_v40  ;;  %v366_v31 = vld [vmem:[%s1644_s2 + $0x48] sm:$0xff]  ;;  %v365_v33 = vld [vmem:[%s1644_s2 + $0x40] sm:$0xff]  ;;  %v368_v35 = vld [vmem:[%s1644_s2 + $0x58] sm:$0xff] }
  0xa4   : > { %v467_v32 = vpack.c.b16 %v460_v29, %v460_v29  ;;  %417 = vperm.xlu1 %1276, %v366_v31   ;;  %v367_v36 = vld [vmem:[%s1644_s2 + $0x50] sm:$0xff] }
  0xa5   : > { %v307_v41 = vmul.f32 %v303_v37, %v303_v37  ;;  %v305_v42 = vmul.f32 0.0009765625, %v301_v38  ;;  %v291_v43 = vrot.slane %v290_v39, 2  ;;  %v306_v51 = vmul.f32 %v302_v46, %v302_v46  ;;  %v878_v38 = vld [vmem:[%s1646_s4] sm:$0xff]  ;;  %v1151_v40 = vld [vmem:[%s1643_s1 + $0x10] sm:$0xff] }
  0xa6   : > { %v336_v8 = vsub.f32 %v1474_v0, %v303_v37  ;;  %v337_v9 = vsub.f32 %v1482_v3, %v303_v37  ;;  %v334_v21 = vsub.f32 %v1476_v1, %v302_v46  ;;  %v335_v22 = vsub.f32 %v1484_v4, %v302_v46  ;;  %v362_v37 = vld [vmem:[%s1644_s2 + $0x28] sm:$0xff]  ;;  %v393_v46 = vpop.permute.xlu2 %392 }
  0xa7   : > { %v309_v44 = vsub.f32 %v305_v42, %v307_v41  ;;  %v292_v45 = vadd.f32 %v291_v43, %v290_v39  ;;  %397 = vperm.xlu0 %1275, %v362_v37   ;;  %v369_v39 = vld [vmem:[%s1644_s2 + $0x60] sm:$0xff]  ;;  %v880_v41 = vld [vmem:[%s1646_s4 + $0x10] sm:$0xff]  ;;  %v879_v42 = vld [vmem:[%s1646_s4 + $0x8] sm:$0xff] }
  0xa8   : > { %v881_v43 = vld [vmem:[%s1646_s4 + $0x18] sm:$0xff] }
  0xa9   : > { %v311_v47 = vmax.f32 %v309_v44, 0.0  ;;  %v293_v48 = vrot.slane %v292_v45, 1  ;;  %v1152_v44 = vld [vmem:[%s1643_s1 + $0x18] sm:$0xff] }
  0xaa   : > { %372 = vperm.xlu2 %1274, %v357_v30  }
  0xab   : > { %v313_v49 = vadd.f32 1e-05, %v311_v47  ;;  %v294_v50 = vadd.f32 %v293_v48, %v292_v45  ;;  %v1153_v45 = vld [vmem:[%s1643_s1 + $0x20] sm:$0xff]  ;;  %v1154_v47 = vld [vmem:[%s1643_s1 + $0x28] sm:$0xff] }
  0xac   : > { %427 = vperm.xlu1 %1276, %v368_v35  }
  0xad   : > { %1277 = vrsqrt.f32 %v313_v49  ;;  %v304_v52 = vmul.f32 0.0009765625, %v294_v50  ;;  %vm330_vm1 = vweird.f32 %v313_v49 }
  0xaf   : > { %v308_v55 = vsub.f32 %v304_v52, %v306_v51 }
  0xb1   : > { %v310_v57 = vmax.f32 %v308_v55, 0.0 }
  0xb2   : > { %412 = vperm.xlu2 %1274, %v365_v33  }
  0xb3   : > { %v1278_v58 = vpop.eup %1277  ;;  %v312_v59 = vadd.f32 1e-05, %v310_v57 }
  0xb4   : > { %v325_v60 = vmul.f32 %v1278_v58, %v313_v49  ;;  %vm331_vm0 = vweird.f32 %v1278_v58  ;;  %884 = vperm.xlu1 %1276, %v878_v38  }
  0xb5   : > { %1279 = vrsqrt.f32 %v312_v59  ;;  %vm332_vm2 = vmor %vm330_vm1, %vm331_vm0  ;;  %vm320_vm4 = vweird.f32 %v312_v59 }
  0xb6   : > { %v326_v62 = vmul.f32 %v1278_v58, %v325_v60  ;;  %v403_v51 = vpop.permute.xlu1 %402 }
  0xb8   : > { %v327_v63 = vmul.f32 0.5, %v326_v62 }
  0xba   : > { %v328_v2 = vsub.f32 1.5, %v327_v63  ;;  %422 = vperm.xlu2 %1274, %v367_v36  }
  0xbb   : > { %v1280_v5 = vpop.eup %1279 }
  0xbc   : > { %v329_v6 = vmul.f32 %v1278_v58, %v328_v2  ;;  %v315_v7 = vmul.f32 %v1280_v5, %v312_v59  ;;  %vm321_vm3 = vweird.f32 %v1280_v5  ;;  %894 = vperm.xlu1 %1276, %v880_v41  }
  0xbd   : > { %vm322_vm5 = vmor %vm320_vm4, %vm321_vm3 }
  0xbe   : > { %v333_v10 = vsel %vm332_vm2, %v1278_v58, %v329_v6  ;;  %v316_v11 = vmul.f32 %v1280_v5, %v315_v7  ;;  %v388_v53 = vpop.permute.xlu1 %387 }
  0xbf   : > { %v340_v14 = vmul.f32 %v336_v8, %v333_v10  ;;  %v341_v15 = vmul.f32 %v337_v9, %v333_v10 }
  0xc0   : > { %v317_v16 = vmul.f32 0.5, %v316_v11 }
  0xc1   : > { %v356_v17 = vpack.c.bf16 %v341_v15, %v340_v14 }
  0xc2   : > { %v318_v18 = vsub.f32 1.5, %v317_v16  ;;  %432 = vperm.xlu2 %1274, %v369_v39  }
  0xc3   : > { %496 = vmatpush.bf16.msra.mxu0 %v356_v17  ;;  %1212 = vmatpush.bf16.msra.mxu3 %v356_v17 }
  0xc4   : > { %v319_v19 = vmul.f32 %v1280_v5, %v318_v18 }
  0xc6   : > { %v323_v23 = vsel %vm322_vm5, %v1280_v5, %v319_v19 }
  0xc7   : > { %v338_v24 = vmul.f32 %v334_v21, %v323_v23  ;;  %v339_v25 = vmul.f32 %v335_v22, %v323_v23 }
  0xc9   : > { %v355_v26 = vpack.c.bf16 %v339_v25, %v338_v24 }
  0xca   : > { %889 = vperm.xlu2 %1274, %v879_v42  }
  0xcb   : > { %497 = vmatpush.bf16.msra.mxu0 %v355_v26  ;;  %1213 = vmatpush.bf16.msra.mxu3 %v355_v26 }
  0xce   : > { %1086 = vmatmul.msk.bf16.vlgmr.msra.gmra.mxu0 %vm468_vm6, %v1149_v27  ;;  %1092 = vmatmul.msk.bf16.vlgmr.msra.gmra.mxu3 %vm468_vm6, %v467_v32 }
  0xd2   : > { %899 = vperm.xlu2 %1274, %v881_v43  }
  0xde   : > { %1087 = vmatmul.msk.bf16.gmra.mxu0 %vm468_vm6, %v1150_v34 }
  0xee   : > { %1088 = vmatmul.msk.bf16.gmra.mxu0 %vm468_vm6, %v1151_v40 }
  0xf4   : > { %v408_v48 = vpop.permute.xlu2 %407 }
  0xfc   : > { %v383_v49 = vpop.permute.xlu2 %382 }
  0xfe   : > { %1089 = vmatmul.msk.bf16.gmra.mxu0 %vm468_vm6, %v1152_v44 }
 0x104   : > { %v373_v50 = vpop.permute.xlu2 %372 }
 0x108   : > { %v378_v56 = vpop.permute.xlu1 %377 }
 0x10c   : > { %v413_v52 = vpop.permute.xlu2 %412 }
 0x10e   : > { %1090 = vmatmul.msk.bf16.gmra.mxu0 %vm468_vm6, %v1153_v45 }
 0x114   : > { %v423_v54 = vpop.permute.xlu2 %422 }
 0x116   : > { %v418_v27 = vpop.permute.xlu1 %417 }
 0x119   : > { %v398_v13 = vpop.permute.xlu0 %397 }
 0x11c   : > { %v433_v60 = vpop.permute.xlu2 %432 }
 0x11e   : > { %1091 = vmatmul.msk.bf16.gmra.mxu0 %vm468_vm6, %v1154_v47  ;;  %v428_v33 = vpop.permute.xlu1 %427 }
 0x14b   : > { %v499_v55 = vpop.f32.mrf.mxu0 }
 0x14c   : > { %v500_v58 = vadd.f32 %v499_v55, %v373_v50 }
 0x151   : > { %v529_v61 = vpop.f32.mrf.mxu3 }
 0x152   : > { %v530_v62 = vadd.f32 %v529_v61, %v433_v60 }
 0x153   : > { %v501_v57 = vpop.f32.mrf.mxu0 }
 0x154   : > { %v502_v59 = vadd.f32 %v501_v57, %v378_v56  ;;  %v545_v2 = vpack.c.bf16 %v530_v62, %v530_v62 }
 0x156   : > { %v1169_v63 = vpack.c.bf16 %v502_v59, %v500_v58  ;;  %558 = vst [vmem:[#allocation2 + $0x30] sm:$0xf] %v545_v2 }
 0x158   : > { %1170 = vst [vmem:[#allocation2] sm:$0xff] %v1169_v63  }
 0x159   : > { %v531_v6 = vpop.f32.mrf.mxu3 }
 0x15b   : > { %v504_v5 = vpop.f32.mrf.mxu0 }
 0x15c   : > { %v505_v8 = vadd.f32 %v504_v5, %v383_v49 }
 0x15f   : > { %v1155_v15 = vld [vmem:[#allocation2] sm:$0xff] }
 0x163   : > { %v506_v7 = vpop.f32.mrf.mxu0 }
 0x164   : > { %v507_v9 = vadd.f32 %v506_v7, %v388_v53 }
 0x166   : > { %v1174_v10 = vpack.c.bf16 %v507_v9, %v505_v8 }
 0x168   : > { %1206 = vst [vmem:[#allocation2 + $0x8] sm:$0xff] %v1174_v10  }
 0x16b   : > { %v509_v11 = vpop.f32.mrf.mxu0 }
 0x16c   : > { %v510_v16 = vadd.f32 %v509_v11, %v393_v46 }
 0x16f   : > { %v1156_v12 = vld [vmem:[#allocation2 + $0x8] sm:$0xff] }
 0x170   : > { %648 = vmatpush.bf16.msra.mxu1 %v1156_v12  ;;  %1214 = vmatpush.bf16.msrb.mxu3 %v1156_v12 }
 0x173   : > { %v511_v14 = vpop.f32.mrf.mxu0 }
 0x174   : > { %v512_v17 = vadd.f32 %v511_v14, %v398_v13  ;;  %649 = vmatpush.bf16.msra.mxu1 %v1155_v15  ;;  %1215 = vmatpush.bf16.msrb.mxu3 %v1155_v15 }
 0x176   : > { %v1179_v18 = vpack.c.bf16 %v512_v17, %v510_v16 }
 0x178   : > { %1207 = vst [vmem:[#allocation2 + $0x10] sm:$0xff] %v1179_v18  }
 0x17b   : > { %v514_v19 = vpop.f32.mrf.mxu0 }
 0x17c   : > { %v515_v22 = vadd.f32 %v514_v19, %v403_v51 }
 0x17f   : > { %v1157_v20 = vld [vmem:[#allocation2 + $0x10] sm:$0xff] }
 0x180   : > { %589 = vxpose.xlu0.c.b16.start [1/2] (short) %v1157_v20, 128 }
 0x183   : > { %v516_v21 = vpop.f32.mrf.mxu0 }
 0x184   : > { %v517_v23 = vadd.f32 %v516_v21, %v408_v48 }
 0x186   : > { %v1184_v24 = vpack.c.bf16 %v517_v23, %v515_v22 }
 0x188   : > { %1208 = vst [vmem:[#allocation2 + $0x18] sm:$0xff] %v1184_v24  }
 0x18b   : > { %v519_v25 = vpop.f32.mrf.mxu0 }
 0x18c   : > { %v520_v29 = vadd.f32 %v519_v25, %v413_v52 }
 0x18f   : > { %v1158_v26 = vld [vmem:[#allocation2 + $0x18] sm:$0xff] }
 0x190   : > { %590 = vxpose.xlu0.c.b16.end [2/2] (short) %v1158_v26, 128 }
 0x193   : > { %v521_v28 = vpop.f32.mrf.mxu0 }
 0x194   : > { %v522_v30 = vadd.f32 %v521_v28, %v418_v27 }
 0x196   : > { %v1189_v31 = vpack.c.bf16 %v522_v30, %v520_v29 }
 0x198   : > { %1209 = vst [vmem:[#allocation2 + $0x20] sm:$0xff] %v1189_v31  }
 0x19b   : > { %v524_v32 = vpop.f32.mrf.mxu0 }
 0x19c   : > { %v525_v35 = vadd.f32 %v524_v32, %v423_v54 }
 0x1a3   : > { %v526_v34 = vpop.f32.mrf.mxu0 }
 0x1a4   : > { %v527_v36 = vadd.f32 %v526_v34, %v428_v33 }
 0x1a6   : > { %v1194_v37 = vpack.c.bf16 %v527_v36, %v525_v35 }
 0x1a8   : > { %1210 = vst [vmem:[#allocation2 + $0x28] sm:$0xff] %v1194_v37  }
 0x22c   : > { %v597_v38 = vpop.trf.xlu0 }
 0x22d   : > { %1109 = vmatmul.msk.bf16.vlgmr.msra.gmra.mxu1 %vm468_vm6, %v597_v38 }
 0x23c   : > { %v598_v39 = vpop.trf.xlu0 }
 0x23d   : > { %1110 = vmatmul.msk.bf16.gmra.mxu1 %vm468_vm6, %v598_v39 }
 0x24c   : > { %v599_v40 = vpop.trf.xlu0 }
 0x24d   : > { %1111 = vmatmul.msk.bf16.gmra.mxu1 %vm468_vm6, %v599_v40 }
 0x25c   : > { %v600_v41 = vpop.trf.xlu0 }
 0x25d   : > { %1112 = vmatmul.msk.bf16.gmra.mxu1 %vm468_vm6, %v600_v41 }
 0x2aa   : > { %v1581_v42 = vpop.f32.mrf.mxu1 }
 0x2b2   : > { %v1583_v43 = vpop.f32.mrf.mxu1 }
 0x2ba   : > { %v656_v44 = vpop.f32.mrf.mxu1 }
 0x2c2   : > { %v658_v45 = vpop.f32.mrf.mxu1 }
 0x2ca   : > { %v661_v46 = vpop.f32.mrf.mxu1 }
 0x2cb   : > { %v740_v50 = vmax.f32 %v1581_v42, %v661_v46 }
 0x2cd   : > { %v744_v54 = vmax.f32 %v740_v50, -1e+30 }
 0x2cf   : > { %v748_v59 = vmax.f32 %v744_v54, -1e+30 }
 0x2d2   : > { %v663_v47 = vpop.f32.mrf.mxu1 }
 0x2d3   : > { %v741_v49 = vmax.f32 %v1583_v43, %v663_v47 }
 0x2d5   : > { %v745_v52 = vmax.f32 %v741_v49, -1e+30 }
 0x2d7   : > { %v749_v57 = vmax.f32 %v745_v52, -1e+30 }
 0x2d9   : > { %v752_v62 = vmax.f32 %v748_v59, %v749_v57 }
 0x2da   : > { %v666_v48 = vpop.f32.mrf.mxu1 }
 0x2db   : > { %v742_v51 = vmax.f32 %v656_v44, %v666_v48 }
 0x2dd   : > { %v746_v55 = vmax.f32 %v742_v51, -1e+30 }
 0x2df   : > { %v750_v60 = vmax.f32 %v746_v55, -1e+30 }
 0x2e2   : > { %v668_v53 = vpop.f32.mrf.mxu1 }
 0x2e3   : > { %v743_v56 = vmax.f32 %v658_v45, %v668_v53 }
 0x2e5   : > { %v747_v58 = vmax.f32 %v743_v56, -1e+30 }
 0x2e7   : > { %v751_v61 = vmax.f32 %v747_v58, -1e+30 }
 0x2e9   : > { %v753_v63 = vmax.f32 %v750_v60, %v751_v61 }
 0x2eb   : > { %v754_v2 = vmax.f32 %v752_v62, %v753_v63 }
 0x2ed   : > { %v755_v5 = vrot.slane %v754_v2, 4 }
 0x2ef   : > { %v756_v6 = vmax.f32 %v754_v2, %v755_v5 }
 0x2f1   : > { %v757_v7 = vrot.slane %v756_v6, 2 }
 0x2f3   : > { %v758_v8 = vmax.f32 %v756_v6, %v757_v7 }
 0x2f5   : > { %v759_v9 = vrot.slane %v758_v8, 1 }
 0x2f7   : > { %v760_v10 = vmax.f32 %v758_v8, %v759_v9  ;;  %v1161_v8 = vld [vmem:[%s1645_s3] sm:$0xff]  ;;  %v1162_v9 = vld [vmem:[%s1645_s3 + $0x8] sm:$0xff] }
 0x2f9   : > { %v769_v11 = vsub.f32 -1e+30, %v760_v10  ;;  %v763_v12 = vsub.f32 %v656_v44, %v760_v10  ;;  %v764_v14 = vsub.f32 %v658_v45, %v760_v10  ;;  %v768_v17 = vsub.f32 %v668_v53, %v760_v10  ;;  %v1159_v44 = vld [vmem:[#allocation2 + $0x20] sm:$0xff]  ;;  %v576_v45 = vld [vmem:[#allocation2 + $0x30] sm:$0xf] }
 0x2fa   : > { %v767_v19 = vsub.f32 %v666_v48, %v760_v10  ;;  %v765_v22 = vsub.f32 %v661_v46, %v760_v10  ;;  %v766_v25 = vsub.f32 %v663_v47, %v760_v10  ;;  %v761_v30 = vsub.f32 %v1581_v42, %v760_v10  ;;  %v601_v48 = vpop.trf.xlu0 }
 0x2fb   : > { %v793_v13 = vmul.f32 1.442695, %v769_v11  ;;  %v781_v15 = vmul.f32 1.442695, %v763_v12  ;;  %v783_v16 = vmul.f32 1.442695, %v764_v14  ;;  %v762_v31 = vsub.f32 %v1583_v43, %v760_v10  ;;  %1113 = vmatmul.msk.bf16.gmra.mxu1 %vm468_vm6, %v601_v48 }
 0x2fc   : > { %v791_v21 = vmul.f32 1.442695, %v768_v17  ;;  %v789_v24 = vmul.f32 1.442695, %v767_v19  ;;  %v785_v28 = vmul.f32 1.442695, %v765_v22  ;;  %v826_v46 = vunpack.c.l.b16 %v576_v45  ;;  %v890_v22 = vpop.permute.xlu2 %889 }
 0x2fd   : > { %1281 = vpow2.f32 %v793_v13  ;;  %v787_v29 = vmul.f32 1.442695, %v766_v25  ;;  %v777_v34 = vmul.f32 1.442695, %v761_v30  ;;  %v779_v35 = vmul.f32 1.442695, %v762_v31 }
 0x2fe   : > { %1283 = vpow2.f32 %v781_v15  ;;  %v1160_v43 = vld [vmem:[#allocation2 + $0x28] sm:$0xff]  ;;  %v829_v47 = vpack.c.b16 %v826_v46, %v826_v46 }
 0x2ff   : > { %1285 = vpow2.f32 %v783_v16 }
 0x300   : > { %1287 = vpow2.f32 %v791_v21 }
 0x301   : > { %1289 = vpow2.f32 %v789_v24 }
 0x302   : > { %1291 = vpow2.f32 %v785_v28  ;;  %v602_v49 = vpop.trf.xlu0 }
 0x303   : > { %v1282_v18 = vpop.eup %1281  ;;  %1293 = vpow2.f32 %v787_v29 }
 0x304   : > { %v813_v20 = vpack.c.bf16 %v1282_v18, %v1282_v18  ;;  %v1284_v23 = vpop.eup %1283  ;;  %1295 = vpow2.f32 %v777_v34  ;;  %v885_v18 = vpop.permute.xlu1 %884 }
 0x305   : > { %v1286_v26 = vpop.eup %1285  ;;  %1297 = vpow2.f32 %v779_v35 }
 0x306   : > { %833 = vmatpush.bf16.msra.mxu2 %v813_v20  ;;  %v810_v27 = vpack.c.bf16 %v1286_v26, %v1284_v23  ;;  %v1288_v32 = vpop.eup %1287 }
 0x307   : > { %v1290_v33 = vpop.eup %1289 }
 0x308   : > { %v1292_v36 = vpop.eup %1291  ;;  %v812_v37 = vpack.c.bf16 %v1288_v32, %v1290_v33 }
 0x309   : > { %v1294_v38 = vpop.eup %1293 }
 0x30a   : > { %834 = vmatpush.bf16.msra.mxu2 %v813_v20  ;;  %v811_v39 = vpack.c.bf16 %v1294_v38, %v1292_v36  ;;  %v1296_v40 = vpop.eup %1295  ;;  %v603_v50 = vpop.trf.xlu0 }
 0x30b   : > { %v1298_v41 = vpop.eup %1297  ;;  %1114 = vmatmul.msk.bf16.gmra.mxu1 %vm468_vm6, %v602_v49  ;;  %1115 = vmatmul.msk.bf16.vlgmr.msrb.gmra.mxu3 %vm468_vm6, %v603_v50 }
 0x30c   : > { %v809_v42 = vpack.c.bf16 %v1298_v41, %v1296_v40  ;;  %v895_v26 = vpop.permute.xlu1 %894 }
 0x30e   : > { %835 = vmatpush.bf16.msra.mxu2 %v813_v20 }
 0x312   : > { %836 = vmatpush.bf16.msra.mxu2 %v813_v20  ;;  %v604_v53 = vpop.trf.xlu0 }
 0x316   : > { %837 = vmatpush.bf16.msra.mxu2 %v812_v37 }
 0x31a   : > { %838 = vmatpush.bf16.msra.mxu2 %v811_v39 }
 0x31b   : > { %1116 = vmatmul.msk.bf16.gmra.mxu3 %vm468_vm6, %v604_v53 }
 0x31e   : > { %839 = vmatpush.bf16.msra.mxu2 %v810_v27 }
 0x322   : > { %840 = vmatpush.bf16.msra.mxu2 %v809_v42 }
 0x325   : > { %841 = vmatmul.bf16.vlgmr.msra.gmra.mxu2 %v1159_v44 }
 0x335   : > { %846 = vmatmul.bf16.gmra.mxu2 %v1160_v43 }
 0x345   : > { %851 = vmatmul.bf16.gmra.mxu2 %v829_v47 }
 0x378   : > { %v671_v10 = vpop.f32.mrf.mxu1 }
 0x380   : > { %v673_v11 = vpop.f32.mrf.mxu1 }
 0x388   : > { %v676_v12 = vpop.f32.mrf.mxu1 }
 0x38e   : > { %v681_v14 = vpop.f32.mrf.mxu3 }
 0x390   : > { %v678_v13 = vpop.f32.mrf.mxu1 }
 0x396   : > { %v683_v15 = vpop.f32.mrf.mxu3 }
 0x39e   : > { %v686_v16 = vpop.f32.mrf.mxu3 }
 0x3a6   : > { %v688_v17 = vpop.f32.mrf.mxu3 }
 0x3a8   : > { %v842_v51 = vpop.f32.mrf.mxu2 }
 0x3b0   : > { %v844_v52 = vpop.f32.mrf.mxu2 }
 0x3b8   : > { %v847_v54 = vpop.f32.mrf.mxu2 }
 0x3c0   : > { %v849_v55 = vpop.f32.mrf.mxu2 }
 0x3c8   : > { %v852_v56 = vpop.f32.mrf.mxu2 }
 0x3c9   : > { %1299 = vrcp.f32 %v852_v56 }
 0x3cf   : > { %v1300_v57 = vpop.eup %1299 }
 0x3d0   : > { %v857_v58 = vperm.slane %v1300_v57, 0  ;;  %v854_v59 = vpop.f32.mrf.mxu2 }
 0x3d2   : > { %v858_v60 = vmul.f32 %v857_v58, %v842_v51  ;;  %v859_v61 = vmul.f32 %v857_v58, %v844_v52  ;;  %v860_v62 = vmul.f32 %v857_v58, %v847_v54  ;;  %v861_v63 = vmul.f32 %v857_v58, %v849_v55 }
 0x3d4   : > { %v1199_v2 = vpack.c.bf16 %v859_v61, %v858_v60  ;;  %v1204_v5 = vpack.c.bf16 %v861_v63, %v860_v62 }
 0x3d6   : > { %1200 = vst [vmem:[#allocation3] sm:$0xff] %v1199_v2  }
 0x3d7   : > { %1211 = vst [vmem:[#allocation3 + $0x8] sm:$0xff] %v1204_v5  }
 0x3dd   : > { %v1163_v7 = vld [vmem:[#allocation3] sm:$0xff] }
 0x3de   : > { %v1164_v6 = vld [vmem:[#allocation3 + $0x8] sm:$0xff] }
 0x3df   : > { %936 = vmatpush.bf16.msra.mxu3 %v1164_v6 }
 0x3e3   : > { %937 = vmatpush.bf16.msra.mxu3 %v1163_v7 }
 0x3e6   : > { %1141 = vmatmul.msk.bf16.vlgmr.msra.gmra.mxu3 %vm468_vm6, %v1161_v8 }
 0x3f6   : > { %1142 = vmatmul.msk.bf16.gmra.mxu3 %vm468_vm6, %v1162_v9 }
 0x469   : > { %v939_v19 = vpop.f32.mrf.mxu3 }
 0x46a   : > { %v940_v20 = vadd.f32 %v939_v19, %v885_v18 }
 0x46c   : > { %v954_v21 = vadd.f32 %v940_v20, %v1476_v1  ;;  %v900_v1 = vpop.permute.xlu2 %899 }
 0x46e   : > { %958 = vst [vmem:[%s231_s29] sm:$0xff] %v954_v21 }
 0x471   : > { %v941_v23 = vpop.f32.mrf.mxu3 }
 0x472   : > { %v942_v24 = vadd.f32 %v941_v23, %v890_v22 }
 0x474   : > { %v955_v25 = vadd.f32 %v942_v24, %v1484_v4 }
 0x476   : > { %959 = vst [vmem:[%s231_s29 + $0x8] sm:$0xff] %v955_v25 }
 0x479   : > { %v944_v27 = vpop.f32.mrf.mxu3 }
 0x47a   : > { %v945_v28 = vadd.f32 %v944_v27, %v895_v26 }
 0x47c   : > { %v956_v29 = vadd.f32 %v945_v28, %v1474_v0 }
 0x47e   : > { %960 = vst [vmem:[%s231_s29 + $0x10] sm:$0xff] %v956_v29 }
 0x481   : > { %v946_v30 = vpop.f32.mrf.mxu3 }
 0x482   : > { %v947_v31 = vadd.f32 %v946_v30, %v900_v1 }
 0x484   : > { %v957_v4 = vadd.f32 %v947_v31, %v1482_v3 }
 0x486   : > { %961 = vst [vmem:[%s231_s29 + $0x18] sm:$0xff] %v957_v4 }
 0x487   : > { %1328 = shalt.err (!%p1325_p5)
}
 0x488   : > { %s1382_s25 = smov 128   ;;  %s1383_s29 = smov 8  }
 0x489   : > { %1216 = dma.vmem_to_hbm [thread:$0]  (%p1454_p4), %s977_s11, 512, %s979_s12, %s963_s13, %s1382_s25, %s1382_s25, %s1383_s29  }
 0x48a PF: > { %p1222_p6 = scmp.ge.s32.totalorder %s1379_s23, 2  ;;  %s993_s7 = sand.u32 1, %s1359_s18  }
 0x48b   : > { %s994_s8 = scalar_lea.sflag [#allocation5], %s993_s7 }
 0x48c   : > { %p1219_p7 = pnand %p1222_p6, %p1461_p8 }
 0x48e   : > { %p1220_p9 = pneg %p1219_p7 }
 0x490   : > { %1354 = dma.done.wait (%p1220_p9), %s994_s8, 512  }
 0x491   : > { %1356 = vsyncadd (%p1220_p9), %s994_s8, 4294966784  ;;  %s18_s23 = sadd.s32 1, %s1379_s23   ;;  %s1650_s18 = smov %s1363_s19 }
 0x492   : > { %p15_p10 = scmp.ge.s32.totalorder %s18_s23, 4   ;;  %s1651_s19 = smov %s1367_s20 }
 0x493   : > { %s1652_s20 = smov %s1467_s6  ;;  %s1653_s21 = smov %s1375_s22 }
 0x494   : > { %s1654_s22 = smov %s1656_s26  ;;  %17 = sbr.rel (!%p15_p10) target bundleno = 4 (0x4), region = 81 }
 0x499   :  { %1000 = vsyncpa [#allocation5], 1 }
 0x49a   :  { %1002 = vsyncpa [#allocation5 + $0x1], 1 }

</bundles_post_ra>
